<compile_context>
chip_gen: v5e
topology: v5e:2x2
jax: 0.10.0
libtpu: 0.0.40
codegen_flags: <defaults>
</compile_context>

<pallas_src>
import jax
import jax.numpy as jnp
import numpy as np
from jax import lax
from jax.experimental import pallas as pl
from jax.experimental.pallas import tpu as pltpu

LANE = 128


def _round_up(x, q):
    return ((x + q - 1) // q) * q


def _mode_layout(modes):
    """Folded-corner mode layout -> (M per corner, 4*M, padded rows, row tile)."""
    m1, m2, m3 = modes
    M = m1 * m2 * m3
    mtot = 4 * M
    mrows = -(-mtot // LANE)
    if mrows < 8:
        mrows_p, tmr = mrows, mrows          # full-extent tile (allowed when == array dim)
    else:
        mrows_p, tmr = _round_up(mrows, 8), 8
    return M, mtot, mrows_p, tmr


def _co_tiling(co):
    """(tCo, Co_pad). Out-channels are a major axis: no sublane alignment needed."""
    if co <= 8:
        return co, co
    for t in (8, 7, 6, 5, 4):
        if co % t == 0:
            return t, co
    return 8, _round_up(co, 8)


# ---------------------------------------------------------------------------
# Pallas kernel: complex contraction over in_channels (3-carry Gauss form)
# ---------------------------------------------------------------------------
def _spectral_mul_kernel(ar_ref, ai_ref, wr_ref, wd_ref, ws_ref, or_ref, oi_ref):
    # ar/ai    : (Ci, tMr, 128)        activation real / imag for one batch element
    # wr/wd/ws : (Ci, tCo, tMr, 128)   weight planes  w_r, (w_i - w_r), (w_r + w_i)
    # or/oi    : (tCo, tMr, 128)       output real / imag
    ci, tco, tmr, lane = wr_ref.shape

    def body(i, carry):
        k1, k2, k3 = carry
        ar = ar_ref[i]                       # (tMr, 128)
        ai = ai_ref[i]
        s = ar + ai                          # small (tMr/8-vreg) activation combo
        # Broadcast over the *major* tCo axis: pure vreg reuse, no sublane relayout.
        k1 = k1 + wr_ref[i] * s[None]
        k2 = k2 + wd_ref[i] * ar[None]
        k3 = k3 + ws_ref[i] * ai[None]
        return k1, k2, k3

    zeros = jnp.zeros((tco, tmr, lane), jnp.float32)
    k1, k2, k3 = lax.fori_loop(0, ci, body, (zeros, zeros, zeros),
                               unroll=min(8, ci))
    # Gauss 3-multiply combine, once (outside the Ci loop):
    #   real = w_r*(ar+ai) - ai*(w_r+w_i) ,  imag = w_r*(ar+ai) + ar*(w_i-w_r)
    or_ref[...] = k1 - k3
    oi_ref[...] = k1 + k2


def spectral_corner_mul(a_re, a_im, w_r, w_d, w_s, *, tco, tmr):
    """a_*: (B, Ci, Mrows, 128) f32 ; w_*: (Ci, Co_pad, Mrows, 128) f32
       -> (o_re, o_im) of shape (B, Co_pad, Mrows, 128) f32."""
    B, Ci, Mrows, lane = a_re.shape
    Co_pad = w_r.shape[1]
    grid = (Mrows // tmr, Co_pad // tco, B)   # batch innermost: weight block DMA'd once

    a_spec = pl.BlockSpec((None, Ci, tmr, lane), lambda mi, oi, b: (b, 0, mi, 0))
    w_spec = pl.BlockSpec((Ci, tco, tmr, lane), lambda mi, oi, b: (0, oi, mi, 0))
    o_spec = pl.BlockSpec((None, tco, tmr, lane), lambda mi, oi, b: (b, oi, mi, 0))

    # Double-buffered per-step VMEM footprint (2 act planes, 3 weight planes, 2 outputs).
    blk = 4 * tmr * lane
    vmem_bytes = 2 * blk * (2 * Ci + 3 * Ci * tco + 2 * tco)
    vmem_limit = int(min(max(vmem_bytes + (8 << 20), 32 << 20), 56 << 20))

    Mp = Mrows * lane
    flops = 6 * B * Ci * Co_pad * Mp + 2 * B * Co_pad * Mp
    bytes_accessed = 4 * (2 * B * Ci * Mp * (Co_pad // tco)   # activations re-read per Co tile
                          + 3 * Ci * Co_pad * Mp              # weights read once
                          + 2 * B * Co_pad * Mp)              # outputs written once

    return pl.pallas_call(
        _spectral_mul_kernel,
        out_shape=(jax.ShapeDtypeStruct((B, Co_pad, Mrows, lane), jnp.float32),
                   jax.ShapeDtypeStruct((B, Co_pad, Mrows, lane), jnp.float32)),
        grid=grid,
        in_specs=[a_spec, a_spec, w_spec, w_spec, w_spec],
        out_specs=(o_spec, o_spec),
        compiler_params=pltpu.CompilerParams(
            dimension_semantics=("parallel", "parallel", "parallel"),
            vmem_limit_bytes=vmem_limit),
        cost_estimate=pl.CostEstimate(
            flops=flops, transcendentals=0, bytes_accessed=bytes_accessed),
    )(a_re, a_im, w_r, w_d, w_s)


# ---------------------------------------------------------------------------
# One-time weight preparation (hoisted out of the per-call forward)
# ---------------------------------------------------------------------------
def prepare_spectral_weights(weights):
    """weights: list of 4 arrays (Ci, Co, m1, m2, m3, 2) float32 (torch layout).
    Returns (w_r, w_d, w_s), each (Ci, Co_pad, Mrows, 128) f32, with the 4 corners folded
    into the flattened mode axis (corner-major), modes padded lane-dense, and the Gauss
    combos  w_d = w_i - w_r ,  w_s = w_r + w_i  precomputed."""
    w = jnp.stack(weights, axis=0).astype(jnp.float32)      # (4, Ci, Co, m1, m2, m3, 2)
    K, Ci, Co, m1, m2, m3, _ = w.shape
    M, mtot, mrows_p, _ = _mode_layout((m1, m2, m3))
    tco, co_pad = _co_tiling(Co)
    mp = mrows_p * LANE
    # fold corners into the mode axis (corner-major), matching the activation concat order
    w = jnp.transpose(w, (1, 2, 0, 3, 4, 5, 6)).reshape(Ci, Co, mtot, 2)
    wr, wi = w[..., 0], w[..., 1]

    def pack(z):
        z = jnp.pad(z, ((0, 0), (0, co_pad - Co), (0, mp - mtot)))
        return z.reshape(Ci, co_pad, mrows_p, LANE)

    return pack(wr), pack(wi - wr), pack(wr + wi)


# ---------------------------------------------------------------------------
# Forward pass (matches SpectralConv3d_fast.forward semantics)
# ---------------------------------------------------------------------------
def spectral_conv3d_fast(x, w_r, w_d, w_s, out_channels, modes):
    """
    x                : (B, C_in, S1, S2, S3) float32
    w_r / w_d / w_s  : prepared weight planes, (C_in, Co_pad, Mrows, 128) float32
    out_channels     : original (unpadded) out-channel count
    modes            : (m1, m2, m3)
    returns          : (B, C_in, S1, S2, S3) float32.  (The original module allocates out_ft
                       with in_channels, so it implicitly requires C_in == C_out.)
    NOTE: if 2*m1 > S1 (etc.) the corner windows overlap; later scatters overwrite earlier
    ones, exactly as in the reference implementation.
    """
    m1, m2, m3 = modes
    B, Ci, S1, S2, S3 = x.shape
    Co = out_channels
    assert Ci == Co, "SpectralConv3d_fast requires in_channels == out_channels"
    M, mtot, mrows_p, tmr = _mode_layout(modes)
    tco, co_pad = _co_tiling(Co)
    mp = mrows_p * LANE
    assert w_r.shape == (Ci, co_pad, mrows_p, LANE)

    # torch.rfft(x, 3, normalized=True, onesided=True) == rfftn(..., norm='ortho')
    x_ft = jnp.fft.rfftn(x, axes=(-3, -2, -1), norm="ortho")  # (B,Ci,S1,S2,S3//2+1) c64

    # Gather the 4 retained-mode corners and fold them into one flattened mode axis
    # (corner-major).  Layout stays (B, Ci, modes): no B<->Ci relayout pass.
    corners = jnp.concatenate(
        [x_ft[:, :, :m1, :m2, :m3].reshape(B, Ci, M),
         x_ft[:, :, -m1:, :m2, :m3].reshape(B, Ci, M),
         x_ft[:, :, :m1, -m2:, :m3].reshape(B, Ci, M),
         x_ft[:, :, -m1:, -m2:, :m3].reshape(B, Ci, M)], axis=-1)      # (B, Ci, 4M)
    pad = ((0, 0), (0, 0), (0, mp - mtot))
    a_re = jnp.pad(jnp.real(corners), pad).astype(jnp.float32).reshape(B, Ci, mrows_p, LANE)
    a_im = jnp.pad(jnp.imag(corners), pad).astype(jnp.float32).reshape(B, Ci, mrows_p, LANE)

    o_re, o_im = spectral_corner_mul(a_re, a_im, w_r, w_d, w_s, tco=tco, tmr=tmr)

    o = (o_re.reshape(B, co_pad, mp)[:, :Co, :mtot]
         + 1j * o_im.reshape(B, co_pad, mp)[:, :Co, :mtot]).astype(jnp.complex64)
    o = o.reshape(B, Co, 4, m1, m2, m3)

    # TODO(synk): the corner gather above and the four scatters below are extra (small)
    # full-spectrum HBM passes; fusing them into the kernel would need manual DMA over
    # non-rectangular slabs.
    out_ft = jnp.zeros((B, Ci, S1, S2, S3 // 2 + 1), dtype=jnp.complex64)
    out_ft = out_ft.at[:, :, :m1, :m2, :m3].set(o[:, :, 0])
    out_ft = out_ft.at[:, :, -m1:, :m2, :m3].set(o[:, :, 1])
    out_ft = out_ft.at[:, :, :m1, -m2:, :m3].set(o[:, :, 2])
    out_ft = out_ft.at[:, :, -m1:, -m2:, :m3].set(o[:, :, 3])

    # torch.irfft(..., normalized=True, onesided=True, signal_sizes=...) == irfftn(norm='ortho')
    return jnp.fft.irfftn(out_ft, s=(S1, S2, S3), axes=(-3, -2, -1), norm="ortho")


# pure-JAX reference (4-multiply complex form, for the correctness check)
def _reference(x, weights, modes):
    m1, m2, m3 = modes
    B, Ci, S1, S2, S3 = x.shape
    x_ft = jnp.fft.rfftn(x, axes=(-3, -2, -1), norm="ortho")

    def cmul(a, w):
        wc = w[..., 0] + 1j * w[..., 1]
        return jnp.einsum("bixyz,ioxyz->boxyz", a, wc)

    out_ft = jnp.zeros((B, Ci, S1, S2, S3 // 2 + 1), dtype=jnp.complex64)
    out_ft = out_ft.at[:, :, :m1, :m2, :m3].set(cmul(x_ft[:, :, :m1, :m2, :m3], weights[0]))
    out_ft = out_ft.at[:, :, -m1:, :m2, :m3].set(cmul(x_ft[:, :, -m1:, :m2, :m3], weights[1]))
    out_ft = out_ft.at[:, :, :m1, -m2:, :m3].set(cmul(x_ft[:, :, :m1, -m2:, :m3], weights[2]))
    out_ft = out_ft.at[:, :, -m1:, -m2:, :m3].set(cmul(x_ft[:, :, -m1:, -m2:, :m3], weights[3]))
    return jnp.fft.irfftn(out_ft, s=(S1, S2, S3), axes=(-3, -2, -1), norm="ortho")


if __name__ == "__main__":
    # small deterministic config (original module requires in_channels == out_channels)
    B, Cin, Cout = 2, 4, 4
    S1, S2, S3 = 8, 8, 8
    m1, m2, m3 = 3, 3, 3
    scale = 1.0 / (Cin * Cout)

    key = jax.random.PRNGKey(0)
    kx, kw1, kw2, kw3, kw4 = jax.random.split(key, 5)
    x = jax.random.normal(kx, (B, Cin, S1, S2, S3), dtype=jnp.float32)
    wshape = (Cin, Cout, m1, m2, m3, 2)
    weights = [scale * jax.random.uniform(k, wshape, dtype=jnp.float32)
               for k in (kw1, kw2, kw3, kw4)]

    # one-time weight layout prep (hoisted out of the per-call forward)
    w_r, w_d, w_s = jax.block_until_ready(prepare_spectral_weights(weights))

    fwd = jax.jit(spectral_conv3d_fast, static_argnums=(4, 5))
    out = jax.block_until_ready(fwd(x, w_r, w_d, w_s, Cout, (m1, m2, m3)))

    ref = jax.block_until_ready(_reference(x, weights, (m1, m2, m3)))
    np.testing.assert_allclose(np.asarray(out), np.asarray(ref), rtol=1e-4, atol=1e-5)
    assert out.shape == (B, Cin, S1, S2, S3) and out.dtype == jnp.float32

    print("KERNEL_OK")
</pallas_src>

<mosaic_0001>
module attributes {stable_mosaic.version = 11 : i64} {
  func.func @_spectral_mul_kernel(%arg0: i32, %arg1: i32, %arg2: i32, %arg3: memref<1x4x1x128xf32, #tpu.memory_space<vmem>>, %arg4: memref<1x4x1x128xf32, #tpu.memory_space<vmem>>, %arg5: memref<4x4x1x128xf32, #tpu.memory_space<vmem>>, %arg6: memref<4x4x1x128xf32, #tpu.memory_space<vmem>>, %arg7: memref<4x4x1x128xf32, #tpu.memory_space<vmem>>, %arg8: memref<1x4x1x128xf32, #tpu.memory_space<vmem>>, %arg9: memref<1x4x1x128xf32, #tpu.memory_space<vmem>>) attributes {dimension_semantics = [#tpu.dimension_semantics<parallel>, #tpu.dimension_semantics<parallel>, #tpu.dimension_semantics<parallel>], iteration_bounds = array<i64: 1, 1, 2>, scalar_prefetch = 0 : i64, scratch_operands = 0 : i64, tpu.core_type = #tpu.core_type<tc>, window_params = [{transform_indices = @transform_0, window_bounds = array<i64: 1, 4, 1, 128>}, {transform_indices = @transform_1, window_bounds = array<i64: 1, 4, 1, 128>}, {transform_indices = @transform_2, window_bounds = array<i64: 4, 4, 1, 128>}, {transform_indices = @transform_3, window_bounds = array<i64: 4, 4, 1, 128>}, {transform_indices = @transform_4, window_bounds = array<i64: 4, 4, 1, 128>}, {transform_indices = @transform_5, window_bounds = array<i64: 1, 4, 1, 128>}, {transform_indices = @transform_6, window_bounds = array<i64: 1, 4, 1, 128>}]} {
    %cst = arith.constant 0.000000e+00 : f32
    %0 = vector.broadcast %cst : f32 to vector<4x1x128xf32>
    %c0_i32 = arith.constant 0 : i32
    %c0 = arith.constant 0 : index
    %1 = arith.index_cast %c0_i32 : i32 to index
    %c0_0 = arith.constant 0 : index
    %c0_1 = arith.constant 0 : index
    %2 = vector.load %arg3[%c0, %1, %c0_0, %c0_1] : memref<1x4x1x128xf32, #tpu.memory_space<vmem>>, vector<1x1x1x128xf32>
    %3 = vector.shape_cast %2 : vector<1x1x1x128xf32> to vector<1x128xf32>
    %c0_2 = arith.constant 0 : index
    %4 = arith.index_cast %c0_i32 : i32 to index
    %c0_3 = arith.constant 0 : index
    %c0_4 = arith.constant 0 : index
    %5 = vector.load %arg4[%c0_2, %4, %c0_3, %c0_4] : memref<1x4x1x128xf32, #tpu.memory_space<vmem>>, vector<1x1x1x128xf32>
    %6 = vector.shape_cast %5 : vector<1x1x1x128xf32> to vector<1x128xf32>
    %7 = arith.addf %3, %6 : vector<1x128xf32>
    %8 = arith.index_cast %c0_i32 : i32 to index
    %c0_5 = arith.constant 0 : index
    %c0_6 = arith.constant 0 : index
    %c0_7 = arith.constant 0 : index
    %9 = vector.load %arg5[%8, %c0_5, %c0_6, %c0_7] : memref<4x4x1x128xf32, #tpu.memory_space<vmem>>, vector<1x4x1x128xf32>
    %10 = vector.shape_cast %9 : vector<1x4x1x128xf32> to vector<4x1x128xf32>
    %11 = vector.shape_cast %7 : vector<1x128xf32> to vector<1x1x128xf32>
    %12 = vector.broadcast %11 : vector<1x1x128xf32> to vector<4x1x128xf32>
    %13 = arith.mulf %10, %12 : vector<4x1x128xf32>
    %14 = arith.addf %0, %13 : vector<4x1x128xf32>
    %15 = arith.index_cast %c0_i32 : i32 to index
    %c0_8 = arith.constant 0 : index
    %c0_9 = arith.constant 0 : index
    %c0_10 = arith.constant 0 : index
    %16 = vector.load %arg6[%15, %c0_8, %c0_9, %c0_10] : memref<4x4x1x128xf32, #tpu.memory_space<vmem>>, vector<1x4x1x128xf32>
    %17 = vector.shape_cast %16 : vector<1x4x1x128xf32> to vector<4x1x128xf32>
    %18 = vector.shape_cast %3 : vector<1x128xf32> to vector<1x1x128xf32>
    %19 = vector.broadcast %18 : vector<1x1x128xf32> to vector<4x1x128xf32>
    %20 = arith.mulf %17, %19 : vector<4x1x128xf32>
    %21 = arith.addf %0, %20 : vector<4x1x128xf32>
    %22 = arith.index_cast %c0_i32 : i32 to index
    %c0_11 = arith.constant 0 : index
    %c0_12 = arith.constant 0 : index
    %c0_13 = arith.constant 0 : index
    %23 = vector.load %arg7[%22, %c0_11, %c0_12, %c0_13] : memref<4x4x1x128xf32, #tpu.memory_space<vmem>>, vector<1x4x1x128xf32>
    %24 = vector.shape_cast %23 : vector<1x4x1x128xf32> to vector<4x1x128xf32>
    %25 = vector.shape_cast %6 : vector<1x128xf32> to vector<1x1x128xf32>
    %26 = vector.broadcast %25 : vector<1x1x128xf32> to vector<4x1x128xf32>
    %27 = arith.mulf %24, %26 : vector<4x1x128xf32>
    %28 = arith.addf %0, %27 : vector<4x1x128xf32>
    %c1_i32 = arith.constant 1 : i32
    %c0_14 = arith.constant 0 : index
    %29 = arith.index_cast %c1_i32 : i32 to index
    %c0_15 = arith.constant 0 : index
    %c0_16 = arith.constant 0 : index
    %30 = vector.load %arg3[%c0_14, %29, %c0_15, %c0_16] : memref<1x4x1x128xf32, #tpu.memory_space<vmem>>, vector<1x1x1x128xf32>
    %31 = vector.shape_cast %30 : vector<1x1x1x128xf32> to vector<1x128xf32>
    %c0_17 = arith.constant 0 : index
    %32 = arith.index_cast %c1_i32 : i32 to index
    %c0_18 = arith.constant 0 : index
    %c0_19 = arith.constant 0 : index
    %33 = vector.load %arg4[%c0_17, %32, %c0_18, %c0_19] : memref<1x4x1x128xf32, #tpu.memory_space<vmem>>, vector<1x1x1x128xf32>
    %34 = vector.shape_cast %33 : vector<1x1x1x128xf32> to vector<1x128xf32>
    %35 = arith.addf %31, %34 : vector<1x128xf32>
    %36 = arith.index_cast %c1_i32 : i32 to index
    %c0_20 = arith.constant 0 : index
    %c0_21 = arith.constant 0 : index
    %c0_22 = arith.constant 0 : index
    %37 = vector.load %arg5[%36, %c0_20, %c0_21, %c0_22] : memref<4x4x1x128xf32, #tpu.memory_space<vmem>>, vector<1x4x1x128xf32>
    %38 = vector.shape_cast %37 : vector<1x4x1x128xf32> to vector<4x1x128xf32>
    %39 = vector.shape_cast %35 : vector<1x128xf32> to vector<1x1x128xf32>
    %40 = vector.broadcast %39 : vector<1x1x128xf32> to vector<4x1x128xf32>
    %41 = arith.mulf %38, %40 : vector<4x1x128xf32>
    %42 = arith.addf %14, %41 : vector<4x1x128xf32>
    %43 = arith.index_cast %c1_i32 : i32 to index
    %c0_23 = arith.constant 0 : index
    %c0_24 = arith.constant 0 : index
    %c0_25 = arith.constant 0 : index
    %44 = vector.load %arg6[%43, %c0_23, %c0_24, %c0_25] : memref<4x4x1x128xf32, #tpu.memory_space<vmem>>, vector<1x4x1x128xf32>
    %45 = vector.shape_cast %44 : vector<1x4x1x128xf32> to vector<4x1x128xf32>
    %46 = vector.shape_cast %31 : vector<1x128xf32> to vector<1x1x128xf32>
    %47 = vector.broadcast %46 : vector<1x1x128xf32> to vector<4x1x128xf32>
    %48 = arith.mulf %45, %47 : vector<4x1x128xf32>
    %49 = arith.addf %21, %48 : vector<4x1x128xf32>
    %50 = arith.index_cast %c1_i32 : i32 to index
    %c0_26 = arith.constant 0 : index
    %c0_27 = arith.constant 0 : index
    %c0_28 = arith.constant 0 : index
    %51 = vector.load %arg7[%50, %c0_26, %c0_27, %c0_28] : memref<4x4x1x128xf32, #tpu.memory_space<vmem>>, vector<1x4x1x128xf32>
    %52 = vector.shape_cast %51 : vector<1x4x1x128xf32> to vector<4x1x128xf32>
    %53 = vector.shape_cast %34 : vector<1x128xf32> to vector<1x1x128xf32>
    %54 = vector.broadcast %53 : vector<1x1x128xf32> to vector<4x1x128xf32>
    %55 = arith.mulf %52, %54 : vector<4x1x128xf32>
    %56 = arith.addf %28, %55 : vector<4x1x128xf32>
    %c2_i32 = arith.constant 2 : i32
    %c0_29 = arith.constant 0 : index
    %57 = arith.index_cast %c2_i32 : i32 to index
    %c0_30 = arith.constant 0 : index
    %c0_31 = arith.constant 0 : index
    %58 = vector.load %arg3[%c0_29, %57, %c0_30, %c0_31] : memref<1x4x1x128xf32, #tpu.memory_space<vmem>>, vector<1x1x1x128xf32>
    %59 = vector.shape_cast %58 : vector<1x1x1x128xf32> to vector<1x128xf32>
    %c0_32 = arith.constant 0 : index
    %60 = arith.index_cast %c2_i32 : i32 to index
    %c0_33 = arith.constant 0 : index
    %c0_34 = arith.constant 0 : index
    %61 = vector.load %arg4[%c0_32, %60, %c0_33, %c0_34] : memref<1x4x1x128xf32, #tpu.memory_space<vmem>>, vector<1x1x1x128xf32>
    %62 = vector.shape_cast %61 : vector<1x1x1x128xf32> to vector<1x128xf32>
    %63 = arith.addf %59, %62 : vector<1x128xf32>
    %64 = arith.index_cast %c2_i32 : i32 to index
    %c0_35 = arith.constant 0 : index
    %c0_36 = arith.constant 0 : index
    %c0_37 = arith.constant 0 : index
    %65 = vector.load %arg5[%64, %c0_35, %c0_36, %c0_37] : memref<4x4x1x128xf32, #tpu.memory_space<vmem>>, vector<1x4x1x128xf32>
    %66 = vector.shape_cast %65 : vector<1x4x1x128xf32> to vector<4x1x128xf32>
    %67 = vector.shape_cast %63 : vector<1x128xf32> to vector<1x1x128xf32>
    %68 = vector.broadcast %67 : vector<1x1x128xf32> to vector<4x1x128xf32>
    %69 = arith.mulf %66, %68 : vector<4x1x128xf32>
    %70 = arith.addf %42, %69 : vector<4x1x128xf32>
    %71 = arith.index_cast %c2_i32 : i32 to index
    %c0_38 = arith.constant 0 : index
    %c0_39 = arith.constant 0 : index
    %c0_40 = arith.constant 0 : index
    %72 = vector.load %arg6[%71, %c0_38, %c0_39, %c0_40] : memref<4x4x1x128xf32, #tpu.memory_space<vmem>>, vector<1x4x1x128xf32>
    %73 = vector.shape_cast %72 : vector<1x4x1x128xf32> to vector<4x1x128xf32>
    %74 = vector.shape_cast %59 : vector<1x128xf32> to vector<1x1x128xf32>
    %75 = vector.broadcast %74 : vector<1x1x128xf32> to vector<4x1x128xf32>
    %76 = arith.mulf %73, %75 : vector<4x1x128xf32>
    %77 = arith.addf %49, %76 : vector<4x1x128xf32>
    %78 = arith.index_cast %c2_i32 : i32 to index
    %c0_41 = arith.constant 0 : index
    %c0_42 = arith.constant 0 : index
    %c0_43 = arith.constant 0 : index
    %79 = vector.load %arg7[%78, %c0_41, %c0_42, %c0_43] : memref<4x4x1x128xf32, #tpu.memory_space<vmem>>, vector<1x4x1x128xf32>
    %80 = vector.shape_cast %79 : vector<1x4x1x128xf32> to vector<4x1x128xf32>
    %81 = vector.shape_cast %62 : vector<1x128xf32> to vector<1x1x128xf32>
    %82 = vector.broadcast %81 : vector<1x1x128xf32> to vector<4x1x128xf32>
    %83 = arith.mulf %80, %82 : vector<4x1x128xf32>
    %84 = arith.addf %56, %83 : vector<4x1x128xf32>
    %c3_i32 = arith.constant 3 : i32
    %c0_44 = arith.constant 0 : index
    %85 = arith.index_cast %c3_i32 : i32 to index
    %c0_45 = arith.constant 0 : index
    %c0_46 = arith.constant 0 : index
    %86 = vector.load %arg3[%c0_44, %85, %c0_45, %c0_46] : memref<1x4x1x128xf32, #tpu.memory_space<vmem>>, vector<1x1x1x128xf32>
    %87 = vector.shape_cast %86 : vector<1x1x1x128xf32> to vector<1x128xf32>
    %c0_47 = arith.constant 0 : index
    %88 = arith.index_cast %c3_i32 : i32 to index
    %c0_48 = arith.constant 0 : index
    %c0_49 = arith.constant 0 : index
    %89 = vector.load %arg4[%c0_47, %88, %c0_48, %c0_49] : memref<1x4x1x128xf32, #tpu.memory_space<vmem>>, vector<1x1x1x128xf32>
    %90 = vector.shape_cast %89 : vector<1x1x1x128xf32> to vector<1x128xf32>
    %91 = arith.addf %87, %90 : vector<1x128xf32>
    %92 = arith.index_cast %c3_i32 : i32 to index
    %c0_50 = arith.constant 0 : index
    %c0_51 = arith.constant 0 : index
    %c0_52 = arith.constant 0 : index
    %93 = vector.load %arg5[%92, %c0_50, %c0_51, %c0_52] : memref<4x4x1x128xf32, #tpu.memory_space<vmem>>, vector<1x4x1x128xf32>
    %94 = vector.shape_cast %93 : vector<1x4x1x128xf32> to vector<4x1x128xf32>
    %95 = vector.shape_cast %91 : vector<1x128xf32> to vector<1x1x128xf32>
    %96 = vector.broadcast %95 : vector<1x1x128xf32> to vector<4x1x128xf32>
    %97 = arith.mulf %94, %96 : vector<4x1x128xf32>
    %98 = arith.addf %70, %97 : vector<4x1x128xf32>
    %99 = arith.index_cast %c3_i32 : i32 to index
    %c0_53 = arith.constant 0 : index
    %c0_54 = arith.constant 0 : index
    %c0_55 = arith.constant 0 : index
    %100 = vector.load %arg6[%99, %c0_53, %c0_54, %c0_55] : memref<4x4x1x128xf32, #tpu.memory_space<vmem>>, vector<1x4x1x128xf32>
    %101 = vector.shape_cast %100 : vector<1x4x1x128xf32> to vector<4x1x128xf32>
    %102 = vector.shape_cast %87 : vector<1x128xf32> to vector<1x1x128xf32>
    %103 = vector.broadcast %102 : vector<1x1x128xf32> to vector<4x1x128xf32>
    %104 = arith.mulf %101, %103 : vector<4x1x128xf32>
    %105 = arith.addf %77, %104 : vector<4x1x128xf32>
    %106 = arith.index_cast %c3_i32 : i32 to index
    %c0_56 = arith.constant 0 : index
    %c0_57 = arith.constant 0 : index
    %c0_58 = arith.constant 0 : index
    %107 = vector.load %arg7[%106, %c0_56, %c0_57, %c0_58] : memref<4x4x1x128xf32, #tpu.memory_space<vmem>>, vector<1x4x1x128xf32>
    %108 = vector.shape_cast %107 : vector<1x4x1x128xf32> to vector<4x1x128xf32>
    %109 = vector.shape_cast %90 : vector<1x128xf32> to vector<1x1x128xf32>
    %110 = vector.broadcast %109 : vector<1x1x128xf32> to vector<4x1x128xf32>
    %111 = arith.mulf %108, %110 : vector<4x1x128xf32>
    %112 = arith.addf %84, %111 : vector<4x1x128xf32>
    %c4_i32 = arith.constant 4 : i32
    %113 = arith.subf %98, %112 : vector<4x1x128xf32>
    %c0_59 = arith.constant 0 : index
    %c0_60 = arith.constant 0 : index
    %c0_61 = arith.constant 0 : index
    %c0_62 = arith.constant 0 : index
    %114 = vector.load %arg8[%c0_59, %c0_60, %c0_61, %c0_62] : memref<1x4x1x128xf32, #tpu.memory_space<vmem>>, vector<1x4x1x128xf32>
    %115 = vector.shape_cast %114 : vector<1x4x1x128xf32> to vector<4x1x128xf32>
    %116 = vector.shape_cast %113 : vector<4x1x128xf32> to vector<1x4x1x128xf32>
    tpu.vector_store %arg8[%c0_59, %c0_60, %c0_61, %c0_62], %116 {strides = array<i32>} : memref<1x4x1x128xf32, #tpu.memory_space<vmem>>, vector<1x4x1x128xf32>,
    %117 = arith.addf %98, %105 : vector<4x1x128xf32>
    %c0_63 = arith.constant 0 : index
    %c0_64 = arith.constant 0 : index
    %c0_65 = arith.constant 0 : index
    %c0_66 = arith.constant 0 : index
    %118 = vector.load %arg9[%c0_63, %c0_64, %c0_65, %c0_66] : memref<1x4x1x128xf32, #tpu.memory_space<vmem>>, vector<1x4x1x128xf32>
    %119 = vector.shape_cast %118 : vector<1x4x1x128xf32> to vector<4x1x128xf32>
    %120 = vector.shape_cast %117 : vector<4x1x128xf32> to vector<1x4x1x128xf32>
    tpu.vector_store %arg9[%c0_63, %c0_64, %c0_65, %c0_66], %120 {strides = array<i32>} : memref<1x4x1x128xf32, #tpu.memory_space<vmem>>, vector<1x4x1x128xf32>,
    return
  }
  func.func @transform_0(%arg0: i32, %arg1: i32, %arg2: i32) -> (i32, i32, i32, i32) {
    %c0_i32 = arith.constant 0 : i32
    %c0_i32_0 = arith.constant 0 : i32
    %c0_i32_1 = arith.constant 0 : i32
    return %arg2, %c0_i32, %arg0, %c0_i32_0 : i32, i32, i32, i32
  }
  func.func @transform_1(%arg0: i32, %arg1: i32, %arg2: i32) -> (i32, i32, i32, i32) {
    %c0_i32 = arith.constant 0 : i32
    %c0_i32_0 = arith.constant 0 : i32
    %c0_i32_1 = arith.constant 0 : i32
    return %arg2, %c0_i32, %arg0, %c0_i32_0 : i32, i32, i32, i32
  }
  func.func @transform_2(%arg0: i32, %arg1: i32, %arg2: i32) -> (i32, i32, i32, i32) {
    %c0_i32 = arith.constant 0 : i32
    %c0_i32_0 = arith.constant 0 : i32
    %c0_i32_1 = arith.constant 0 : i32
    return %c0_i32, %arg1, %arg0, %c0_i32_0 : i32, i32, i32, i32
  }
  func.func @transform_3(%arg0: i32, %arg1: i32, %arg2: i32) -> (i32, i32, i32, i32) {
    %c0_i32 = arith.constant 0 : i32
    %c0_i32_0 = arith.constant 0 : i32
    %c0_i32_1 = arith.constant 0 : i32
    return %c0_i32, %arg1, %arg0, %c0_i32_0 : i32, i32, i32, i32
  }
  func.func @transform_4(%arg0: i32, %arg1: i32, %arg2: i32) -> (i32, i32, i32, i32) {
    %c0_i32 = arith.constant 0 : i32
    %c0_i32_0 = arith.constant 0 : i32
    %c0_i32_1 = arith.constant 0 : i32
    return %c0_i32, %arg1, %arg0, %c0_i32_0 : i32, i32, i32, i32
  }
  func.func @transform_5(%arg0: i32, %arg1: i32, %arg2: i32) -> (i32, i32, i32, i32) {
    %c0_i32 = arith.constant 0 : i32
    %c0_i32_0 = arith.constant 0 : i32
    return %arg2, %arg1, %arg0, %c0_i32 : i32, i32, i32, i32
  }
  func.func @transform_6(%arg0: i32, %arg1: i32, %arg2: i32) -> (i32, i32, i32, i32) {
    %c0_i32 = arith.constant 0 : i32
    %c0_i32_0 = arith.constant 0 : i32
    return %arg2, %arg1, %arg0, %c0_i32 : i32, i32, i32, i32
  }
}

</mosaic_0001>

<bundles_post_ra>
// kernel: spectral_conv3d_fast.1
= control target key start
LH: loop header
LB: loop body
LE: loop exit
PB: predicated region body
PF: predicated region fallthrough
CT: control target
= control target key end

     0   :  { %s975_s21 = smov 0   ;;  %s977_s22 = smov 0   ;;  %s1258_s0 = inlined_call_operand.vmem [shape: f32[2,4,1,128], index: 0, kind: input, shape index: {}]   ;;  %s1259_s1 = inlined_call_operand.vmem [shape: f32[2,4,1,128], index: 1, kind: input, shape index: {}]   ;;  %s1260_s2 = inlined_call_operand.vmem [shape: f32[4,4,1,128], index: 2, kind: input, shape index: {}]   ;;  %s1261_s3 = inlined_call_operand.vmem [shape: f32[4,4,1,128], index: 3, kind: input, shape index: {}]   ;;  %s1262_s4 = inlined_call_operand.vmem [shape: f32[4,4,1,128], index: 4, kind: input, shape index: {}]   ;;  %s1263_s5 = inlined_call_operand.vmem [shape: f32[2,4,1,128], index: 5, kind: output, shape index: {0}]   ;;  %s1264_s6 = inlined_call_operand.vmem [shape: f32[2,4,1,128], index: 6, kind: output, shape index: {1}]  }
   0x1   :  { %s979_s23 = smov 0  }
   0x2 LB: > { %s29_s24 = sadd.s32 1, %s934_s22  ;;  %p843_p0 = scmp.ge.s32.totalorder %s938_s23, 1  ;;  %s938_s23 = sphi %s979_s23, %s17_s23   ;;  %s934_s22 = sphi %s977_s22, %s1266_s22   ;;  %s930_s21 = sphi %s975_s21, %s1265_s21  }
   0x3   : > { %p30_p1 = scmp.ge.s32.totalorder %s29_s24, 2  ;;  %p305_p2 = scmp.lt.s32.totalorder %s938_s23, 3 }
   0x5   : > { %s1268_s24 = smov (%p30_p1, %s29_s24), 0  ;;  %p306_p3 = pnand %p843_p0, %p305_p2 }
   0x6   : > { %p382_p4 = scmp.lt.s32.totalorder (!%p306_p3), %s930_s21, 1 }
   0x7   : > { %309 = sbr.rel (%p306_p3) target bundleno = 49 (0x31), region = 40 }
   0xc   : > { %s1270_s21 = smov (!%p382_p4, %s930_s21), 1  ;;  %v471_v0 = vld [vmem:[%s1262_s4] sm:$0x1]  ;;  %v858_v1 = vld [vmem:[%s1262_s4 + $0x4] sm:$0x1] }
   0xd   : > { %s999_s29 = sshll.u32 %s1270_s21, 2  ;;  %v447_v2 = vld [vmem:[%s1260_s2] sm:$0x1]  ;;  %v872_v3 = vld [vmem:[%s1262_s4 + $0x8] sm:$0x1] }
   0xe   : > { %v472_v4 = vld [vmem:[%s1262_s4 + $0x1] sm:$0x1]  ;;  %s388_s14 = scalar_lea.vmem %s1258_s0, %s999_s29  ;;  %s395_s17 = scalar_lea.vmem %s1259_s1, %s999_s29  ;;  %v850_v5 = vld [vmem:[%s1260_s2 + $0x4] sm:$0x1]  ;;  %v864_v6 = vld [vmem:[%s1260_s2 + $0x8] sm:$0x1] }
   0xf   : > { %v886_v7 = vld [vmem:[%s1262_s4 + $0xc] sm:$0x1]  ;;  %v448_v8 = vld [vmem:[%s1260_s2 + $0x1] sm:$0x1]  ;;  %v851_v9 = vld [vmem:[%s1260_s2 + $0x5] sm:$0x1]  ;;  %s1153_s8 = scalar_lea.vmem %s1263_s5, %s999_s29  ;;  %s442_s11 = scalar_lea.vmem %s1264_s6, %s999_s29 }
  0x10   : > { %v1033_v10 = vld [vmem:[%s388_s14] sm:$0x1]  ;;  %v1037_v12 = vld [vmem:[%s388_s14 + $0x1] sm:$0x1]  ;;  %v878_v13 = vld [vmem:[%s1260_s2 + $0xc] sm:$0x1] }
  0x11   : > { %v1035_v11 = vld [vmem:[%s395_s17] sm:$0x1]  ;;  %v859_v14 = vld [vmem:[%s1262_s4 + $0x5] sm:$0x1]  ;;  %v865_v15 = vld [vmem:[%s1260_s2 + $0x9] sm:$0x1] }
  0x12   : > { %v1050_v16 = vadd.f32 %v1035_v11, %v1033_v10  ;;  %v475_v17 = vmul.f32 %v471_v0, %v1035_v11  ;;  %v1053_v18 = vld [vmem:[%s395_s17 + $0x1] sm:$0x1]  ;;  %v1055_v19 = vld [vmem:[%s388_s14 + $0x2] sm:$0x1]  ;;  %v476_v21 = vmul.f32 %v472_v4, %v1035_v11  ;;  %v1070_v26 = vld [vmem:[%s388_s14 + $0x3] sm:$0x1] }
  0x13   : > { %v1057_v20 = vld [vmem:[%s395_s17 + $0x2] sm:$0x1]  ;;  %v1062_v22 = vadd.f32 %v1053_v18, %v1037_v12  ;;  %v519_v23 = vmul.f32 %v858_v1, %v1053_v18  ;;  %v1072_v27 = vld [vmem:[%s395_s17 + $0x3] sm:$0x1]  ;;  %v873_v28 = vld [vmem:[%s1262_s4 + $0x9] sm:$0x1]  ;;  %v520_v42 = vmul.f32 %v859_v14, %v1053_v18 }
  0x14   : > { %v1067_v24 = vadd.f32 %v1057_v20, %v1055_v19  ;;  %v563_v25 = vmul.f32 %v872_v3, %v1057_v20  ;;  %v451_v29 = vmul.f32 %v447_v2, %v1050_v16  ;;  %v1080_v30 = vadd.f32 %v1072_v27, %v1070_v26  ;;  %v879_v33 = vld [vmem:[%s1260_s2 + $0xd] sm:$0x1]  ;;  %v449_v39 = vld [vmem:[%s1260_s2 + $0x2] sm:$0x1]  ;;  %v852_v45 = vld [vmem:[%s1260_s2 + $0x6] sm:$0x1] }
  0x15   : > { %v607_v31 = vmul.f32 %v886_v7, %v1072_v27  ;;  %v452_v32 = vmul.f32 %v448_v8, %v1050_v16  ;;  %v493_v34 = vmul.f32 %v850_v5, %v1062_v22  ;;  %v523_v35 = vadd.f32 %v519_v23, %v475_v17  ;;  %v887_v38 = vld [vmem:[%s1262_s4 + $0xd] sm:$0x1]  ;;  %v473_v40 = vld [vmem:[%s1262_s4 + $0x2] sm:$0x1]  ;;  %v860_v50 = vld [vmem:[%s1262_s4 + $0x6] sm:$0x1] }
  0x16   : > { %v537_v36 = vmul.f32 %v864_v6, %v1067_v24  ;;  %v494_v37 = vmul.f32 %v851_v9, %v1062_v22  ;;  %v581_v41 = vmul.f32 %v878_v13, %v1080_v30  ;;  %v538_v43 = vmul.f32 %v865_v15, %v1067_v24  ;;  %v866_v51 = vld [vmem:[%s1260_s2 + $0xa] sm:$0x1]  ;;  %v880_v57 = vld [vmem:[%s1260_s2 + $0xe] sm:$0x1]  ;;  %v450_v63 = vld [vmem:[%s1260_s2 + $0x3] sm:$0x1] }
  0x17   : > { %v564_v44 = vmul.f32 %v873_v28, %v1057_v20  ;;  %v497_v46 = vadd.f32 %v493_v34, %v451_v29  ;;  %v567_v47 = vadd.f32 %v563_v25, %v523_v35  ;;  %v582_v49 = vmul.f32 %v879_v33, %v1080_v30  ;;  %v874_v52 = vld [vmem:[%s1262_s4 + $0xa] sm:$0x1]  ;;  %v888_v62 = vld [vmem:[%s1262_s4 + $0xe] sm:$0x1]  ;;  %v474_v4 = vld [vmem:[%s1262_s4 + $0x3] sm:$0x1] }
  0x18   : > { %v498_v48 = vadd.f32 %v494_v37, %v452_v32  ;;  %v524_v53 = vadd.f32 %v520_v42, %v476_v21  ;;  %v608_v54 = vmul.f32 %v887_v38, %v1072_v27  ;;  %v453_v55 = vmul.f32 %v449_v39, %v1050_v16  ;;  %v853_v5 = vld [vmem:[%s1260_s2 + $0x7] sm:$0x1]  ;;  %v867_v14 = vld [vmem:[%s1260_s2 + $0xb] sm:$0x1]  ;;  %v881_v28 = vld [vmem:[%s1260_s2 + $0xf] sm:$0x1] }
  0x19   : > { %v477_v56 = vmul.f32 %v473_v40, %v1035_v11  ;;  %v541_v58 = vadd.f32 %v537_v36, %v497_v46  ;;  %v611_v59 = vadd.f32 %v607_v31, %v567_v47  ;;  %v495_v61 = vmul.f32 %v852_v45, %v1062_v22  ;;  %v861_v13 = vld [vmem:[%s1262_s4 + $0x7] sm:$0x1]  ;;  %v875_v25 = vld [vmem:[%s1262_s4 + $0xb] sm:$0x1]  ;;  %v459_v34 = vld [vmem:[%s1261_s3] sm:$0x1] }
  0x1a   : > { %v542_v60 = vadd.f32 %v538_v43, %v498_v48  ;;  %v568_v0 = vadd.f32 %v564_v44, %v524_v53  ;;  %v521_v1 = vmul.f32 %v860_v50, %v1053_v18  ;;  %v539_v2 = vmul.f32 %v866_v51, %v1067_v24  ;;  %v882_v39 = vld [vmem:[%s1261_s3 + $0xc] sm:$0x1]  ;;  %v855_v43 = vld [vmem:[%s1261_s3 + $0x5] sm:$0x1] }
  0x1b   : > { %v565_v3 = vmul.f32 %v874_v52, %v1057_v20  ;;  %v1138_v6 = vadd.f32 %v581_v41, %v541_v58  ;;  %v499_v8 = vadd.f32 %v495_v61, %v453_v55  ;;  %v583_v9 = vmul.f32 %v880_v57, %v1080_v30  ;;  %v856_v52 = vld [vmem:[%s1261_s3 + $0x6] sm:$0x1]  ;;  %v870_v57 = vld [vmem:[%s1261_s3 + $0xa] sm:$0x1]  ;;  %v884_v58 = vld [vmem:[%s1261_s3 + $0xe] sm:$0x1] }
  0x1c   : > { %v1140_v7 = vadd.f32 %v582_v49, %v542_v60  ;;  %v612_v15 = vadd.f32 %v608_v54, %v568_v0  ;;  %v525_v17 = vadd.f32 %v521_v1, %v477_v56  ;;  %v609_v21 = vmul.f32 %v888_v62, %v1072_v27  ;;  %v857_v0 = vld [vmem:[%s1261_s3 + $0x7] sm:$0x1] }
  0x1d   : > { %v454_v23 = vmul.f32 %v450_v63, %v1050_v16  ;;  %v615_v29 = vsub.f32 %v1138_v6, %v611_v59  ;;  %v543_v31 = vadd.f32 %v539_v2, %v499_v8  ;;  %v478_v32 = vmul.f32 %v474_v4, %v1035_v11  ;;  %v889_v16 = vld [vmem:[%s1262_s4 + $0xf] sm:$0x1]  ;;  %v854_v11 = vld [vmem:[%s1261_s3 + $0x4] sm:$0x1]  ;;  %v462_v59 = vld [vmem:[%s1261_s3 + $0x3] sm:$0x1] }
  0x1e   : > { %v496_v33 = vmul.f32 %v853_v5, %v1062_v22  ;;  %v616_v35 = vsub.f32 %v1140_v7, %v612_v15  ;;  %v569_v36 = vadd.f32 %v565_v3, %v525_v17  ;;  %v522_v37 = vmul.f32 %v861_v13, %v1053_v18  ;;  %v868_v22 = vld [vmem:[%s1261_s3 + $0x8] sm:$0x1]  ;;  %v871_v5 = vld [vmem:[%s1261_s3 + $0xb] sm:$0x1]  ;;  %v885_v15 = vld [vmem:[%s1261_s3 + $0xf] sm:$0x1] }
  0x1f   : > { %v540_v38 = vmul.f32 %v867_v14, %v1067_v24  ;;  %619 = vst [vmem:[%s1153_s8] sm:$0x1] %v615_v29  ;;  %v587_v40 = vadd.f32 %v583_v9, %v543_v31  ;;  %v566_v42 = vmul.f32 %v875_v25, %v1057_v20  ;;  %v584_v18 = vmul.f32 %v881_v28, %v1080_v30  ;;  %v460_v24 = vld [vmem:[%s1261_s3 + $0x1] sm:$0x1]  ;;  %v869_v20 = vld [vmem:[%s1261_s3 + $0x9] sm:$0x1] }
  0x20   : > { %v500_v41 = vadd.f32 %v496_v33, %v454_v23  ;;  %620 = vst [vmem:[%s1153_s8 + $0x1] sm:$0x1] %v616_v35  ;;  %v613_v44 = vadd.f32 %v609_v21, %v569_v36  ;;  %v526_v45 = vadd.f32 %v522_v37, %v478_v32  ;;  %v610_v46 = vmul.f32 %v889_v16, %v1072_v27  ;;  %v883_v30 = vld [vmem:[%s1261_s3 + $0xd] sm:$0x1]  ;;  %v461_v27 = vld [vmem:[%s1261_s3 + $0x2] sm:$0x1] }
  0x21   : > { %v463_v47 = vmul.f32 %v459_v34, %v1033_v10  ;;  %v506_v49 = vmul.f32 %v854_v11, %v1037_v12  ;;  %v550_v50 = vmul.f32 %v868_v22, %v1055_v19  ;;  %v594_v51 = vmul.f32 %v882_v39, %v1070_v26 }
  0x22   : > { %v544_v48 = vadd.f32 %v540_v38, %v500_v41  ;;  %v617_v53 = vsub.f32 %v587_v40, %v613_v44  ;;  %v570_v54 = vadd.f32 %v566_v42, %v526_v45  ;;  %v464_v55 = vmul.f32 %v460_v24, %v1033_v10 }
  0x23   : > { %v507_v56 = vmul.f32 %v855_v43, %v1037_v12  ;;  %v510_v61 = vadd.f32 %v506_v49, %v463_v47  ;;  %v551_v62 = vmul.f32 %v869_v20, %v1055_v19  ;;  %v595_v63 = vmul.f32 %v883_v30, %v1070_v26 }
  0x24   : > { %v588_v60 = vadd.f32 %v584_v18, %v544_v48  ;;  %621 = vst [vmem:[%s1153_s8 + $0x2] sm:$0x1] %v617_v53  ;;  %v614_v1 = vadd.f32 %v610_v46, %v570_v54  ;;  %v465_v3 = vmul.f32 %v461_v27, %v1033_v10  ;;  %v508_v4 = vmul.f32 %v856_v52, %v1037_v12 }
  0x25   : > { %v511_v2 = vadd.f32 %v507_v56, %v464_v55  ;;  %v554_v8 = vadd.f32 %v550_v50, %v510_v61  ;;  %v552_v9 = vmul.f32 %v870_v57, %v1055_v19  ;;  %v596_v13 = vmul.f32 %v884_v58, %v1070_v26 }
  0x26   : > { %v466_v14 = vmul.f32 %v462_v59, %v1033_v10  ;;  %v618_v17 = vsub.f32 %v588_v60, %v614_v1  ;;  %v512_v23 = vadd.f32 %v508_v4, %v465_v3  ;;  %v509_v25 = vmul.f32 %v857_v0, %v1037_v12 }
  0x27   : > { %v555_v21 = vadd.f32 %v551_v62, %v511_v2  ;;  %v598_v28 = vadd.f32 %v594_v51, %v554_v8  ;;  %v553_v29 = vmul.f32 %v871_v5, %v1055_v19  ;;  %v597_v33 = vmul.f32 %v885_v15, %v1070_v26 }
  0x28   : > { %622 = vst [vmem:[%s1153_s8 + $0x3] sm:$0x1] %v618_v17  ;;  %v556_v32 = vadd.f32 %v552_v9, %v512_v23  ;;  %v513_v10 = vadd.f32 %v509_v25, %v466_v14 }
  0x29   : > { %v599_v31 = vadd.f32 %v595_v63, %v555_v21  ;;  %v623_v16 = vadd.f32 %v598_v28, %v1138_v6 }
  0x2a   : > { %v600_v35 = vadd.f32 %v596_v13, %v556_v32  ;;  %v557_v36 = vadd.f32 %v553_v29, %v513_v10 }
  0x2b   : > { %v624_v34 = vadd.f32 %v599_v31, %v1140_v7  ;;  %627 = vst [vmem:[%s442_s11] sm:$0x1] %v623_v16 }
  0x2c   : > { %v625_v12 = vadd.f32 %v600_v35, %v587_v40  ;;  %v601_v19 = vadd.f32 %v597_v33, %v557_v36 }
  0x2d   : > { %628 = vst [vmem:[%s442_s11 + $0x1] sm:$0x1] %v624_v34 }
  0x2e   : > { %629 = vst [vmem:[%s442_s11 + $0x2] sm:$0x1] %v625_v12  ;;  %v626_v37 = vadd.f32 %v601_v19, %v588_v60 }
  0x30   : > { %630 = vst [vmem:[%s442_s11 + $0x3] sm:$0x1] %v626_v37 }
  0x31 PF: > { %s17_s23 = sadd.s32 1, %s938_s23   ;;  %s1265_s21 = smov %s934_s22 }
  0x32   : > { %p14_p5 = scmp.ge.s32.totalorder %s17_s23, 4   ;;  %s1266_s22 = smov %s1268_s24 }
  0x34   :  { %16 = sbr.rel (!%p14_p5) target bundleno = 2 (0x2), region = 109 }

// kernel: reverse.1
= control target key start
LH: loop header
LB: loop body
LE: loop exit
PB: predicated region body
PF: predicated region fallthrough
CT: control target
= control target key end

     0   :  { %s296_s0 = inlined_call_operand.vmem [shape: f32[2,4,8,8,3], index: 0, kind: input, shape index: {}]   ;;  %s297_s1 = inlined_call_operand.vmem [shape: f32[2,4,8,8,3], index: 1, kind: output, shape index: {}]  }
   0x1   :  { %v96_v0 = vld [vmem:[%s296_s0 + $0x10] sm:$0xff]  ;;  %v99_v2 = vld [vmem:[%s296_s0 + $0x28] sm:$0xff]  ;;  %v103_v4 = vld [vmem:[%s296_s0 + $0x40] sm:$0xff] }
   0x2   :  { %v97_v1 = vld [vmem:[%s296_s0 + $0x70] sm:$0xff]  ;;  %4 = vst [vmem:[%s297_s1] sm:$0xff] %v96_v0  ;;  %v101_v3 = vld [vmem:[%s296_s0 + $0x88] sm:$0xff]  ;;  %v105_v5 = vld [vmem:[%s296_s0 + $0xa0] sm:$0xff] }
   0x3   :  { %98 = vst [vmem:[%s297_s1 + $0x60] sm:$0xff] %v97_v1  ;;  %v107_v6 = vld [vmem:[%s296_s0 + $0x58] sm:$0xff]  ;;  %v111_v8 = vld [vmem:[%s296_s0 + $0x8] sm:$0xff]  ;;  %v115_v10 = vld [vmem:[%s296_s0 + $0x20] sm:$0xff] }
   0x4   :  { %100 = vst [vmem:[%s297_s1 + $0x18] sm:$0xff] %v99_v2  ;;  %v109_v7 = vld [vmem:[%s296_s0 + $0xb8] sm:$0xff]  ;;  %v113_v9 = vld [vmem:[%s296_s0 + $0x68] sm:$0xff]  ;;  %v117_v11 = vld [vmem:[%s296_s0 + $0x80] sm:$0xff] }
   0x5   :  { %102 = vst [vmem:[%s297_s1 + $0x78] sm:$0xff] %v101_v3  ;;  %v119_v12 = vld [vmem:[%s296_s0 + $0x38] sm:$0xff]  ;;  %v123_v14 = vld [vmem:[%s296_s0 + $0x50] sm:$0xff]  ;;  %v65_v16 = vld [vmem:[%s296_s0] sm:$0xff] }
   0x6   :  { %104 = vst [vmem:[%s297_s1 + $0x30] sm:$0xff] %v103_v4  ;;  %v121_v13 = vld [vmem:[%s296_s0 + $0x98] sm:$0xff]  ;;  %v125_v15 = vld [vmem:[%s296_s0 + $0xb0] sm:$0xff]  ;;  %v128_v17 = vld [vmem:[%s296_s0 + $0x60] sm:$0xff] }
   0x7   :  { %106 = vst [vmem:[%s297_s1 + $0x90] sm:$0xff] %v105_v5  ;;  %v130_v18 = vld [vmem:[%s296_s0 + $0x18] sm:$0xff]  ;;  %v134_v20 = vld [vmem:[%s296_s0 + $0x30] sm:$0xff]  ;;  %v138_v22 = vld [vmem:[%s296_s0 + $0x48] sm:$0xff] }
   0x8   :  { %108 = vst [vmem:[%s297_s1 + $0x48] sm:$0xff] %v107_v6  ;;  %v132_v19 = vld [vmem:[%s296_s0 + $0x78] sm:$0xff]  ;;  %v136_v21 = vld [vmem:[%s296_s0 + $0x90] sm:$0xff]  ;;  %v140_v23 = vld [vmem:[%s296_s0 + $0xa8] sm:$0xff] }
   0x9   :  { %110 = vst [vmem:[%s297_s1 + $0xa8] sm:$0xff] %v109_v7 }
   0xa   :  { %112 = vst [vmem:[%s297_s1 + $0x8] sm:$0xff] %v111_v8 }
   0xb   :  { %114 = vst [vmem:[%s297_s1 + $0x68] sm:$0xff] %v113_v9 }
   0xc   :  { %116 = vst [vmem:[%s297_s1 + $0x20] sm:$0xff] %v115_v10 }
   0xd   :  { %118 = vst [vmem:[%s297_s1 + $0x80] sm:$0xff] %v117_v11 }
   0xe   :  { %120 = vst [vmem:[%s297_s1 + $0x38] sm:$0xff] %v119_v12 }
   0xf   :  { %122 = vst [vmem:[%s297_s1 + $0x98] sm:$0xff] %v121_v13 }
  0x10   :  { %124 = vst [vmem:[%s297_s1 + $0x50] sm:$0xff] %v123_v14 }
  0x11   :  { %126 = vst [vmem:[%s297_s1 + $0xb0] sm:$0xff] %v125_v15 }
  0x12   :  { %127 = vst [vmem:[%s297_s1 + $0x10] sm:$0xff] %v65_v16 }
  0x13   :  { %129 = vst [vmem:[%s297_s1 + $0x70] sm:$0xff] %v128_v17 }
  0x14   :  { %131 = vst [vmem:[%s297_s1 + $0x28] sm:$0xff] %v130_v18 }
  0x15   :  { %133 = vst [vmem:[%s297_s1 + $0x88] sm:$0xff] %v132_v19 }
  0x16   :  { %135 = vst [vmem:[%s297_s1 + $0x40] sm:$0xff] %v134_v20 }
  0x17   :  { %137 = vst [vmem:[%s297_s1 + $0xa0] sm:$0xff] %v136_v21 }
  0x18   :  { %139 = vst [vmem:[%s297_s1 + $0x58] sm:$0xff] %v138_v22 }
  0x19   :  { %141 = vst [vmem:[%s297_s1 + $0xb8] sm:$0xff] %v140_v23 }

</bundles_post_ra>
